<compile_context>
chip_gen: v5e
topology: v5e:2x2
jax: 0.10.0
libtpu: 0.0.40
codegen_flags: <defaults>
</compile_context>

<pallas_src>
import math

import jax
import jax.numpy as jnp
from jax.experimental import pallas as pl
from jax.experimental.pallas import tpu as pltpu


# ----------------------------------------------------------------------------- kernels
def _mlp_kernel_resident(x_ref, w1_ref, b1_ref, w2_ref, b2_ref, o_ref):
    """Hidden dim fully resident: o = W2 @ relu(W1 @ x + b1) + b2, direct store."""
    # x_ref: (1, Cin, TM) at the HBM dtype -> cast per-tile to the MXU compute dtype.
    x = x_ref[0].astype(w1_ref.dtype)                                   # (Cin, TM)
    h = jnp.dot(w1_ref[...], x, preferred_element_type=jnp.float32)     # (Hid, TM) f32
    h = jnp.maximum(h + b1_ref[...], 0.0)                               # bias + ReLU, f32
    o = jnp.dot(w2_ref[...], h.astype(w2_ref.dtype),
                preferred_element_type=jnp.float32)                     # (Cout, TM) f32
    o_ref[...] = (o + b2_ref[...]).astype(o_ref.dtype)[None]


def _mlp_kernel_split(x_ref, w1_ref, b1_ref, w2_ref, b2_ref, o_ref, acc_ref):
    """Hidden dim split across grid axis 2; f32 accumulator seeded with b2."""
    hk = pl.program_id(2)

    @pl.when(hk == 0)
    def _init():
        acc_ref[...] = jnp.broadcast_to(b2_ref[...], acc_ref.shape)

    x = x_ref[0].astype(w1_ref.dtype)                                   # (Cin, TM)
    h = jnp.dot(w1_ref[...], x, preferred_element_type=jnp.float32)     # (TH, TM) f32
    h = jnp.maximum(h + b1_ref[...], 0.0)
    acc_ref[...] += jnp.dot(w2_ref[...], h.astype(w2_ref.dtype),
                            preferred_element_type=jnp.float32)         # (Cout, TM)

    @pl.when(hk == pl.num_programs(2) - 1)
    def _finalize():
        o_ref[...] = acc_ref[...].astype(o_ref.dtype)[None]


# --------------------------------------------------------------------- tiling / budget
def _pad_up(n, m):
    return ((n + m - 1) // m) * m


def _padded_block_bytes(shape, dtype):
    """Bytes of a VMEM block after (sublane, 128-lane) padding of the last two dims."""
    itemsize = jnp.dtype(dtype).itemsize
    sublane = {4: 8, 2: 16, 1: 32}.get(itemsize, 8)
    dims = list(shape)
    if len(dims) >= 1:
        dims[-1] = _pad_up(dims[-1], 128)
    if len(dims) >= 2:
        dims[-2] = _pad_up(dims[-2], sublane)
    n = 1
    for d in dims:
        n *= d
    return n * itemsize


def _vmem_budget_bytes():
    """~75% of physical VMEM (96 MiB on v5e/v6e, 48 MiB on v7x); conservative fallback."""
    cap = 64 * 1024 * 1024
    try:
        info = pltpu.get_tpu_info()
        cap = int(getattr(info, "vmem_capacity_bytes", cap))
    except Exception:
        pass
    return (cap * 3) // 4


def _choose_tm(T, tm_target):
    """Token tile: full extent when it fits, else the largest 128-multiple <= target."""
    if T <= max(tm_target, 128):
        return T
    return max(128, (tm_target // 128) * 128)


def _choose_th(Hid, tm, Cin, Cout, cdtype, budget):
    """Hidden tile. Prefer full residency (constant weight index maps => zero re-fetch);
    otherwise split, keeping the f32 intermediate h (~th*tm*4 B) at a few MiB."""
    w_resident = 2 * (_padded_block_bytes((Hid, Cin), cdtype)
                      + _padded_block_bytes((Cout, Hid), cdtype)
                      + _padded_block_bytes((Hid, 1), jnp.float32)
                      + _padded_block_bytes((Cout, 1), jnp.float32))
    h_resident = (_padded_block_bytes((Hid, tm), jnp.float32)
                  + _padded_block_bytes((Hid, tm), cdtype))
    if w_resident <= budget // 4 and h_resident <= budget // 2:
        return Hid
    th = (4 * 1024 * 1024) // max(tm * 4, 1)          # ~4 MiB f32 hidden intermediate
    th = max(128, (th // 128) * 128)
    return min(th, _pad_up(Hid, 128))


def _vmem_estimate_bytes(Cin, th, Cout, tm, x_dtype, cdtype, out_dtype):
    est = 0
    est += 2 * _padded_block_bytes((Cin, tm), x_dtype)        # x tile (HBM dtype), 2-buf
    est += 2 * _padded_block_bytes((Cout, tm), out_dtype)     # output tile, 2-buf
    est += 2 * _padded_block_bytes((th, Cin), cdtype)         # w1 chunk
    est += 2 * _padded_block_bytes((Cout, th), cdtype)        # w2 chunk
    est += 2 * _padded_block_bytes((th, 1), jnp.float32)      # b1 (lane-padded!)
    est += 2 * _padded_block_bytes((Cout, 1), jnp.float32)    # b2 (lane-padded!)
    est += _padded_block_bytes((Cin, tm), cdtype)             # in-kernel x cast
    est += _padded_block_bytes((th, tm), jnp.float32)         # h (f32)
    est += _padded_block_bytes((th, tm), cdtype)              # h cast for 2nd matmul
    est += _padded_block_bytes((Cout, tm), jnp.float32)       # epilogue / accumulator
    return est


# --------------------------------------------------------------------------- wrapper
def mlp_pallas_nct(x, w1, b1, w2, b2, *, tm=2048, compute_dtype=jnp.bfloat16,
                   out_dtype=None):
    """x: (N, Cin, T) at its HBM dtype. w1: (Hid, Cin), b1: (Hid,1)/(Hid,),
    w2: (Cout, Hid), b2: (Cout,1)/(Cout,). Returns (N, Cout, T) in out_dtype (default x.dtype)."""
    N, Cin, T = x.shape
    Hid = w1.shape[0]
    Cout = w2.shape[0]
    out_dtype = out_dtype if out_dtype is not None else x.dtype

    budget = _vmem_budget_bytes()
    tm_eff = _choose_tm(T, tm)
    th = _choose_th(Hid, tm_eff, Cin, Cout, compute_dtype, budget)
    if th >= Hid:
        th, Hid_p = Hid, Hid
    else:
        Hid_p = _pad_up(Hid, th)
    n_h = Hid_p // th
    split = n_h > 1

    # Shrink the token tile if the padded footprint exceeds the per-generation budget.
    while _vmem_estimate_bytes(Cin, th, Cout, tm_eff, x.dtype, compute_dtype,
                               out_dtype) > budget and tm_eff > 256:
        tm_eff = max(256, ((tm_eff // 2) // 128) * 128)

    # Weights / biases: bf16 MXU operands, f32 biases; zero-pad the hidden axis when the
    # split tile does not divide Hid (exact: padded rows/cols contribute 0).
    w1c = w1.astype(compute_dtype)
    w2c = w2.astype(compute_dtype)
    b1c = b1.astype(jnp.float32).reshape(Hid, 1)
    b2c = b2.astype(jnp.float32).reshape(Cout, 1)
    if Hid_p != Hid:
        pad = Hid_p - Hid
        w1c = jnp.pad(w1c, ((0, pad), (0, 0)))
        b1c = jnp.pad(b1c, ((0, pad), (0, 0)))
        w2c = jnp.pad(w2c, ((0, 0), (0, pad)))

    n_token = pl.cdiv(T, tm_eff)
    total_steps = N * n_token * n_h

    # Deeper input buffering only pays off when the grid is long and the per-step x tile
    # is tiny (almost no compute to hide DMA issue latency under).
    x_tile_bytes = _padded_block_bytes((Cin, tm_eff), x.dtype)
    deep_buffer = (total_steps >= 8) and (x_tile_bytes <= (1 << 20))

    if split:
        grid = (N, n_token, n_h)
        x_map = lambda n, t, h: (n, 0, t)
        x_spec = (pl.BlockSpec((1, Cin, tm_eff), x_map, pipeline_mode=pl.Buffered(3))
                  if deep_buffer else pl.BlockSpec((1, Cin, tm_eff), x_map))
        in_specs = [
            x_spec,
            pl.BlockSpec((th, Cin), lambda n, t, h: (h, 0)),
            pl.BlockSpec((th, 1), lambda n, t, h: (h, 0)),
            pl.BlockSpec((Cout, th), lambda n, t, h: (0, h)),
            pl.BlockSpec((Cout, 1), lambda n, t, h: (0, 0)),
        ]
        out_specs = pl.BlockSpec((1, Cout, tm_eff), lambda n, t, h: (n, 0, t))
        scratch = [pltpu.VMEM((Cout, tm_eff), jnp.float32)]
        kernel = _mlp_kernel_split
        semantics = ("parallel", "parallel", "arbitrary")
    else:
        grid = (N, n_token)
        x_map = lambda n, t: (n, 0, t)
        x_spec = (pl.BlockSpec((1, Cin, tm_eff), x_map, pipeline_mode=pl.Buffered(3))
                  if deep_buffer else pl.BlockSpec((1, Cin, tm_eff), x_map))
        in_specs = [
            x_spec,
            pl.BlockSpec((Hid_p, Cin), lambda n, t: (0, 0)),
            pl.BlockSpec((Hid_p, 1), lambda n, t: (0, 0)),
            pl.BlockSpec((Cout, Hid_p), lambda n, t: (0, 0)),
            pl.BlockSpec((Cout, 1), lambda n, t: (0, 0)),
        ]
        out_specs = pl.BlockSpec((1, Cout, tm_eff), lambda n, t: (n, 0, t))
        scratch = []
        kernel = _mlp_kernel_resident
        semantics = ("parallel", "parallel")

    footprint = _vmem_estimate_bytes(Cin, th, Cout, tm_eff, x.dtype, compute_dtype,
                                     out_dtype)
    vmem_limit = int(min(budget, max(32 * 1024 * 1024, (footprint * 5) // 4)))

    x_b = jnp.dtype(x.dtype).itemsize
    c_b = jnp.dtype(compute_dtype).itemsize
    o_b = jnp.dtype(out_dtype).itemsize
    weight_bytes = (Hid_p * Cin + Cout * Hid_p) * c_b + (Hid_p + Cout) * 4
    weight_fetches = (N * n_token) if split else 1     # resident weights DMA'd once
    cost = pl.CostEstimate(
        flops=2 * N * T * (Cin * Hid_p + Hid_p * Cout),
        transcendentals=0,
        bytes_accessed=int(N * Cin * T * x_b + N * Cout * T * o_b
                           + weight_fetches * weight_bytes),
    )

    return pl.pallas_call(
        kernel,
        out_shape=jax.ShapeDtypeStruct((N, Cout, T), out_dtype),
        grid_spec=pltpu.PrefetchScalarGridSpec(
            num_scalar_prefetch=0,
            grid=grid,
            in_specs=in_specs,
            out_specs=out_specs,
            scratch_shapes=scratch,
        ),
        compiler_params=pltpu.CompilerParams(
            dimension_semantics=semantics,
            vmem_limit_bytes=vmem_limit,
        ),
        cost_estimate=cost,
    )(x, w1c, b1c, w2c, b2c)


def mlp_forward_nchw(x_nchw, params, *, tm=2048, compute_dtype=jnp.bfloat16,
                     out_dtype=None):
    """Forward matching the PyTorch module: NCHW in, NCHW out (no transposes)."""
    N, C, H, W = x_nchw.shape
    x_tok = x_nchw.reshape(N, C, H * W)          # free reshape (contiguous dims)
    out_tok = mlp_pallas_nct(
        x_tok, params["w1"], params["b1"], params["w2"], params["b2"],
        tm=tm, compute_dtype=compute_dtype, out_dtype=out_dtype)
    Cout = out_tok.shape[1]
    return out_tok.reshape(N, Cout, H, W)        # free reshape back to NCHW


# ------------------------------------------------------------------------------ init
def _trunc_normal(key, shape, std):
    # PyTorch trunc_normal_ truncates at +/- 2*std around mean 0.
    return std * jax.random.truncated_normal(key, -2.0, 2.0, shape, jnp.float32)


def init_mlp_params(key, network_depth, in_features, hidden_features, out_features):
    gain = (8 * network_depth) ** (-1.0 / 4.0)
    # Conv2d(in, hid, 1): fan_in=in, fan_out=hid; Conv2d(hid, out, 1): fan_in=hid, fan_out=out.
    std1 = gain * math.sqrt(2.0 / float(in_features + hidden_features))
    std2 = gain * math.sqrt(2.0 / float(hidden_features + out_features))
    k1, k2 = jax.random.split(key)
    # Stored in PyTorch conv layout (out_ch, in_ch) so the kernel uses them directly.
    w1 = _trunc_normal(k1, (hidden_features, in_features), std1)
    w2 = _trunc_normal(k2, (out_features, hidden_features), std2)
    b1 = jnp.zeros((hidden_features, 1), jnp.float32)
    b2 = jnp.zeros((out_features, 1), jnp.float32)
    return {"w1": w1, "b1": b1, "w2": w2, "b2": b2}


# ------------------------------------------------------------------------------ demo
if __name__ == "__main__":
    key = jax.random.PRNGKey(0)
    k_param, k_x = jax.random.split(key)

    network_depth = 4
    in_features = 4
    hidden_features = 32
    out_features = in_features  # module default: out_features or in_features

    params = init_mlp_params(
        k_param, network_depth, in_features, hidden_features, out_features)

    x = jax.random.normal(k_x, (2, 4, 16, 16), jnp.float32)  # NCHW

    out = jax.block_until_ready(mlp_forward_nchw(x, params))
    assert out.shape == (2, out_features, 16, 16)

    # Reference in the same precision regime (bf16 operands, f32 accumulation).
    bf = jnp.bfloat16
    xt = x.reshape(2, in_features, 16 * 16).astype(bf)
    h = jnp.einsum("hc,nct->nht", params["w1"].astype(bf), xt,
                   preferred_element_type=jnp.float32) + params["b1"][None]
    h = jnp.maximum(h, 0.0)
    ref = jnp.einsum("oh,nht->not", params["w2"].astype(bf), h.astype(bf),
                     preferred_element_type=jnp.float32) + params["b2"][None]
    ref = ref.reshape(2, out_features, 16, 16)

    err = float(jnp.max(jnp.abs(out - ref)))
    assert jnp.allclose(out, ref, atol=2e-2, rtol=2e-2), f"max abs err {err}"

    print("KERNEL_OK")
</pallas_src>

<mosaic_0001>
module attributes {stable_mosaic.version = 11 : i64} {
  func.func @_mlp_kernel_resident(%arg0: i32, %arg1: i32, %arg2: memref<1x4x256xf32, #tpu.memory_space<vmem>>, %arg3: memref<32x4xbf16, #tpu.memory_space<vmem>>, %arg4: memref<32x1xf32, #tpu.memory_space<vmem>>, %arg5: memref<4x32xbf16, #tpu.memory_space<vmem>>, %arg6: memref<4x1xf32, #tpu.memory_space<vmem>>, %arg7: memref<1x4x256xf32, #tpu.memory_space<vmem>>) attributes {dimension_semantics = [#tpu.dimension_semantics<parallel>, #tpu.dimension_semantics<parallel>], iteration_bounds = array<i64: 2, 1>, scalar_prefetch = 0 : i64, scratch_operands = 0 : i64, tpu.core_type = #tpu.core_type<tc>, window_params = [{transform_indices = @transform_0, window_bounds = array<i64: 1, 4, 256>}, {pipeline_mode = #tpu.pipeline_mode<synchronous>, transform_indices = @transform_1, window_bounds = array<i64: 32, 4>}, {pipeline_mode = #tpu.pipeline_mode<synchronous>, transform_indices = @transform_2, window_bounds = array<i64: 32, 1>}, {pipeline_mode = #tpu.pipeline_mode<synchronous>, transform_indices = @transform_3, window_bounds = array<i64: 4, 32>}, {pipeline_mode = #tpu.pipeline_mode<synchronous>, transform_indices = @transform_4, window_bounds = array<i64: 4, 1>}, {transform_indices = @transform_5, window_bounds = array<i64: 1, 4, 256>}]} {
    %c0 = arith.constant 0 : index
    %c0_0 = arith.constant 0 : index
    %c0_1 = arith.constant 0 : index
    %0 = vector.load %arg2[%c0, %c0_0, %c0_1] : memref<1x4x256xf32, #tpu.memory_space<vmem>>, vector<1x4x256xf32>
    %1 = vector.shape_cast %0 : vector<1x4x256xf32> to vector<4x256xf32>
    %2 = arith.truncf %1 : vector<4x256xf32> to vector<4x256xbf16>
    %c0_2 = arith.constant 0 : index
    %c0_3 = arith.constant 0 : index
    %3 = vector.load %arg3[%c0_2, %c0_3] : memref<32x4xbf16, #tpu.memory_space<vmem>>, vector<32x4xbf16>
    %cst = arith.constant dense<0.000000e+00> : vector<32x256xf32>
    %4 = tpu.matmul %3, %2, %cst {dimension_numbers = #tpu.dot_dimension_numbers<[1], [0], [0], [1], [0, 0, 1, 1], [], []>} : vector<32x4xbf16>, vector<4x256xbf16>, vector<32x256xf32> -> vector<32x256xf32>
    %c0_4 = arith.constant 0 : index
    %c0_5 = arith.constant 0 : index
    %5 = vector.load %arg4[%c0_4, %c0_5] : memref<32x1xf32, #tpu.memory_space<vmem>>, vector<32x1xf32>
    %6 = vector.broadcast %5 : vector<32x1xf32> to vector<32x256xf32>
    %7 = arith.addf %4, %6 : vector<32x256xf32>
    %cst_6 = arith.constant 0.000000e+00 : f32
    %8 = vector.broadcast %cst_6 : f32 to vector<32x256xf32>
    %9 = arith.maximumf %7, %8 : vector<32x256xf32>
    %c0_7 = arith.constant 0 : index
    %c0_8 = arith.constant 0 : index
    %10 = vector.load %arg5[%c0_7, %c0_8] : memref<4x32xbf16, #tpu.memory_space<vmem>>, vector<4x32xbf16>
    %11 = arith.truncf %9 : vector<32x256xf32> to vector<32x256xbf16>
    %cst_9 = arith.constant dense<0.000000e+00> : vector<4x256xf32>
    %12 = tpu.matmul %10, %11, %cst_9 {dimension_numbers = #tpu.dot_dimension_numbers<[1], [0], [0], [1], [0, 0, 1, 1], [], []>} : vector<4x32xbf16>, vector<32x256xbf16>, vector<4x256xf32> -> vector<4x256xf32>
    %c0_10 = arith.constant 0 : index
    %c0_11 = arith.constant 0 : index
    %13 = vector.load %arg6[%c0_10, %c0_11] : memref<4x1xf32, #tpu.memory_space<vmem>>, vector<4x1xf32>
    %14 = vector.broadcast %13 : vector<4x1xf32> to vector<4x256xf32>
    %15 = arith.addf %12, %14 : vector<4x256xf32>
    %16 = vector.shape_cast %15 : vector<4x256xf32> to vector<1x4x256xf32>
    %c0_12 = arith.constant 0 : index
    %c0_13 = arith.constant 0 : index
    %c0_14 = arith.constant 0 : index
    %17 = vector.load %arg7[%c0_12, %c0_13, %c0_14] : memref<1x4x256xf32, #tpu.memory_space<vmem>>, vector<1x4x256xf32>
    tpu.vector_store %arg7[%c0_12, %c0_13, %c0_14], %16 {strides = array<i32>} : memref<1x4x256xf32, #tpu.memory_space<vmem>>, vector<1x4x256xf32>,
    return
  }
  func.func @transform_0(%arg0: i32, %arg1: i32) -> (i32, i32, i32) {
    %c0_i32 = arith.constant 0 : i32
    %c0_i32_0 = arith.constant 0 : i32
    return %arg0, %c0_i32, %arg1 : i32, i32, i32
  }
  func.func @transform_1(%arg0: i32, %arg1: i32) -> (i32, i32) {
    %c0_i32 = arith.constant 0 : i32
    %c0_i32_0 = arith.constant 0 : i32
    %c0_i32_1 = arith.constant 0 : i32
    return %c0_i32, %c0_i32_0 : i32, i32
  }
  func.func @transform_2(%arg0: i32, %arg1: i32) -> (i32, i32) {
    %c0_i32 = arith.constant 0 : i32
    %c0_i32_0 = arith.constant 0 : i32
    %c0_i32_1 = arith.constant 0 : i32
    return %c0_i32, %c0_i32_0 : i32, i32
  }
  func.func @transform_3(%arg0: i32, %arg1: i32) -> (i32, i32) {
    %c0_i32 = arith.constant 0 : i32
    %c0_i32_0 = arith.constant 0 : i32
    %c0_i32_1 = arith.constant 0 : i32
    return %c0_i32, %c0_i32_0 : i32, i32
  }
  func.func @transform_4(%arg0: i32, %arg1: i32) -> (i32, i32) {
    %c0_i32 = arith.constant 0 : i32
    %c0_i32_0 = arith.constant 0 : i32
    %c0_i32_1 = arith.constant 0 : i32
    return %c0_i32, %c0_i32_0 : i32, i32
  }
  func.func @transform_5(%arg0: i32, %arg1: i32) -> (i32, i32, i32) {
    %c0_i32 = arith.constant 0 : i32
    %c0_i32_0 = arith.constant 0 : i32
    return %arg0, %c0_i32, %arg1 : i32, i32, i32
  }
}

</mosaic_0001>

<bundles_post_ra>
// kernel: tpu_custom_call.1
= control target key start
LH: loop header
LB: loop body
LE: loop exit
PB: predicated region body
PF: predicated region fallthrough
CT: control target
= control target key end

     0   :  { %10 = vsyncpa [#allocation3], 0  ;;  %s827_s0 = inlined_call_operand.vmem [shape: f32[2,4,256], index: 0, kind: input, shape index: {}]   ;;  %s828_s1 = inlined_call_operand.vmem [shape: bf16[32,4], index: 1, kind: input, shape index: {}]   ;;  %s829_s2 = inlined_call_operand.vmem [shape: f32[32,1], index: 2, kind: input, shape index: {}]   ;;  %s830_s3 = inlined_call_operand.vmem [shape: bf16[4,32], index: 3, kind: input, shape index: {}]   ;;  %s831_s4 = inlined_call_operand.vmem [shape: f32[4,1], index: 4, kind: input, shape index: {}]   ;;  %s832_s5 = inlined_call_operand.hbm [shape: f32[2,4,256], index: 5, kind: output, shape index: {}]  }
   0x1   :  { %12 = vsyncpa [#allocation3 + $0x1], 0  ;;  %s706_s18 = smov 0   ;;  %s708_s19 = smov 0  }
   0x2   :  { %s710_s20 = smov 0   ;;  %s712_s21 = smov 0  }
   0x3   :  { %s714_s22 = smov 0   ;;  %s716_s23 = smov 0  }
   0x4 LB: > { %s505_s24 = sadd.s32 4294967295, %s673_s23   ;;  %s506_s25 = sadd.s32 4294967294, %s673_s23   ;;  %s673_s23 = sphi %s716_s23, %s18_s23   ;;  %s669_s22 = sphi %s714_s22, %s839_s22   ;;  %s665_s21 = sphi %s712_s21, %s838_s21   ;;  %s661_s20 = sphi %s710_s20, %s837_s20   ;;  %s657_s19 = sphi %s708_s19, %s836_s19   ;;  %s653_s18 = sphi %s706_s18, %s835_s18  }
   0x5   : > { %s30_s26 = sadd.s32 1, %s669_s22  ;;  %s151_s27 = sadd.s32 1, %s661_s20 }
   0x6   : > { %p32_p0 = scmp.ge.s32.totalorder %s30_s26, 2  ;;  %p161_p1 = scmp.ne.s32.totalorder %s661_s20, %s657_s19 }
   0x7   : > { %p162_p2 = scmp.eq.s32.totalorder %s505_s24, 1  ;;  %p167_p3 = scmp.ne.s32.totalorder %s657_s19, %s653_s18 }
   0x8   : > { %s841_s26 = smov (%p32_p0, %s30_s26), 0  ;;  %p168_p5 = scmp.eq.s32.totalorder %s506_s25, 1 }
   0x9   : > { %p746_p4 = por %p162_p2, %p161_p1  ;;  %s146_s29 = ssub.s32 %s669_s22, %s841_s26 }
   0xa   : > { %p509_p6 = scmp.ge.s32.totalorder %s673_s23, 1  ;;  %p149_p7 = scmp.eq.s32.totalorder %s146_s29, 0 }
   0xb   : > { %p753_p8 = por %p168_p5, %p167_p3  ;;  %p211_p9 = scmp.lt.s32.totalorder %s673_s23, 3 }
   0xc   : > { %s759_s6 = scalar_select %p149_p7, %s661_s20, %s151_s27  }
   0xd   : > { %p212_p10 = pnand %p509_p6, %p211_p9 }
   0xe   : > { %p244_p11 = scmp.lt.s32.totalorder (!%p212_p10), %s665_s21, 1  ;;  %s535_s15 = sshll.u32 (!%p212_p10), %s665_s21, 3 }
   0xf   : > { %215 = sbr.rel (%p212_p10) target bundleno = 342 (0x156), region = 40  ;;  %s424_s24 = scalar_lea.hbm (!%p212_p10), %s832_s5, %s535_s15 }
  0x10   : > { %s428_s29 = sshll.u32 (!%p212_p10), %s424_s24, 4  ;;  %s615_s11 = scalar_lea.hbm (!%p212_p10), %s832_s5, 16  ;;  %s429_s29 = int_to_ptr.hbm [resolvable:$true] %s428_s29 }
  0x11   : > { %s609_s7 = sshra.s32 (!%p212_p10), %s429_s29, 4  ;;  %s610_s7 = int_to_ptr.hbm [resolvable:$true] %s609_s7 }
  0x12   : > { %s611_s8 = scalar_lea.hbm (!%p212_p10), %s610_s7, 8  ;;  %p616_p1 = scmp.lt.s32.totalorder (!%p212_p10), %s610_s7, %s832_s5 }
  0x13   : > { %p612_p12 = scmp.ne.s32.totalorder (!%p212_p10), %s610_s7, %s611_s8  ;;  %p617_p2 = scmp.lt.s32.totalorder (!%p212_p10), %s615_s11, %s611_s8 }
  0x14   : > { %v268_v0 = vld [vmem:[%s829_s2] sm:$0xff]  ;;  %v675_v1 = vmov 0   ;;  %s245_s9 = scalar_select %p244_p11, %s665_s21, 1  ;;  %v270_v2 = vld [vmem:[%s829_s2 + $0x10] sm:$0xff]  ;;  %v269_v4 = vld [vmem:[%s829_s2 + $0x8] sm:$0xff]  ;;  %vm309_vm0 = vcmask 1041408  }
  0x15   : > { %593 = vset.pattern.permute.xlu1 %v675_v1  ;;  %592 = vset.pattern.permute.xlu0 %v675_v1  ;;  %v271_v5 = vld [vmem:[%s829_s2 + $0x18] sm:$0xff]  ;;  %v533_v12 = vld [vmem:[%s828_s1] sm:$0xff]  ;;  %vm302_vm1 = vcmask 31744   ;;  %v534_v13 = vld [vmem:[%s828_s1 + $0x8] sm:$0xff]  ;;  %vm373_vm2 = vcmask 261120   ;;  %vm406_vm3 = vcmask 1043456   ;;  %p613_p13 = pnand %p612_p12, %p746_p4  ;;  %p618_p3 = por %p617_p2, %p616_p1 }
  0x16   : > { %274 = vperm.xlu1 %593, %v268_v0   ;;  %594 = vset.pattern.permute.xlu2 %v675_v1  ;;  %s532_s10 = sshll.u32 %s245_s9, 3  ;;  %v367_v16 = vld [vmem:[%s831_s4] sm:$0xf] }
  0x17   : > { %s251_s13 = scalar_lea.vmem %s827_s0, %s532_s10  ;;  %284 = vperm.xlu0 %592, %v270_v2   ;;  %370 = vperm.xlu2 %594, %v367_v16   ;;  %v362_v47 = vld [vmem:[%s830_s3] sm:$0x3]  ;;  %p614_p0 = pneg %p613_p13 }
  0x18   : > { %v255_v3 = vld [vmem:[%s251_s13] sm:$0xff]  ;;  %s240_s13 = sand.u32 1, %s657_s19  }
  0x19   : > { %257 = vst [vmem:[#allocation1] ss:$2 sm:$0xff] %v255_v3  ;;  %s510_s14 = sshll.u32 %s240_s13, 3  ;;  %s411_s21 = scalar_lea.sflag [#allocation3], %s240_s13 }
  0x1a   : > { %s242_s25 = scalar_lea.vmem [#allocation2], %s510_s14  ;;  %p619_p5 = pnand %p618_p3, %p614_p0 }
  0x1b   : > { %s426_s27 = sshll.u32 %s242_s25, 4  ;;  %s427_s27 = int_to_ptr.vmem [resolvable:$true] %s426_s27 }
  0x1e   : > { %279 = vperm.xlu1 %593, %v269_v4  }
  0x1f   : > { %289 = vperm.xlu0 %592, %v271_v5  }
  0x20   : > { %v258_v6 = vld.sshfl [vmem:[#allocation1] sm:$0xff pattern:$0x75316420]  ;;  %v259_v7 = vld.sshfl [vmem:[#allocation1 + $0x8] sm:$0xff pattern:$0x75316420] }
  0x21   : > { %v262_v8 = vpack.c.bf16 %v258_v6, %v258_v6  ;;  %v263_v9 = vpack.c.bf16 %v259_v7, %v259_v7 }
  0x23   : > { %v311_v10 = vsel %vm309_vm0, %v262_v8, 0  ;;  %v314_v11 = vsel %vm309_vm0, %v263_v9, 0 }
  0x24   : > { %323 = vmatpush.bf16.msra.mxu0 %v311_v10  ;;  %342 = vmatpush.bf16.msra.mxu1 %v314_v11 }
  0x27   : > { %521 = vmatmul.msk.bf16.vlgmr.msra.gmra.mxu0 %vm302_vm1, %v533_v12  ;;  %523 = vmatmul.msk.bf16.vlgmr.msra.gmra.mxu1 %vm302_vm1, %v533_v12 }
  0x37   : > { %522 = vmatmul.msk.bf16.gmra.mxu0 %vm302_vm1, %v534_v13  ;;  %524 = vmatmul.msk.bf16.gmra.mxu1 %vm302_vm1, %v534_v13 }
  0x71   : > { %v371_v48 = vpop.permute.xlu2 %370 }
  0x88   : > { %v275_v19 = vpop.permute.xlu1 %274 }
  0x89   : > { %v285_v20 = vpop.permute.xlu0 %284 }
  0x90   : > { %v280_v23 = vpop.permute.xlu1 %279 }
  0x91   : > { %v290_v24 = vpop.permute.xlu0 %289 }
  0xa4   : > { %v325_v14 = vpop.f32.mrf.mxu0  ;;  %v344_v15 = vpop.f32.mrf.mxu1 }
  0xa5   : > { %v326_v33 = vadd.f32 %v325_v14, %v275_v19  ;;  %v345_v34 = vadd.f32 %v344_v15, %v275_v19 }
  0xa7   : > { %v354_v43 = vmax.f32 %v326_v33, 0.0  ;;  %v355_v44 = vmax.f32 %v345_v34, 0.0 }
  0xac   : > { %v327_v17 = vpop.f32.mrf.mxu0  ;;  %v346_v18 = vpop.f32.mrf.mxu1 }
  0xad   : > { %v328_v29 = vadd.f32 %v327_v17, %v280_v23  ;;  %v347_v30 = vadd.f32 %v346_v18, %v280_v23 }
  0xaf   : > { %v356_v39 = vmax.f32 %v328_v29, 0.0  ;;  %v357_v40 = vmax.f32 %v347_v30, 0.0 }
  0xb1   : > { %v363_v45 = vpack.c.bf16 %v356_v39, %v354_v43  ;;  %v364_v46 = vpack.c.bf16 %v357_v40, %v355_v44 }
  0xb4   : > { %v330_v21 = vpop.f32.mrf.mxu0  ;;  %v349_v22 = vpop.f32.mrf.mxu1 }
  0xb5   : > { %v331_v25 = vadd.f32 %v330_v21, %v285_v20  ;;  %v350_v26 = vadd.f32 %v349_v22, %v285_v20 }
  0xb7   : > { %v358_v35 = vmax.f32 %v331_v25, 0.0  ;;  %v359_v36 = vmax.f32 %v350_v26, 0.0 }
  0xbc   : > { %v332_v27 = vpop.f32.mrf.mxu0  ;;  %v351_v28 = vpop.f32.mrf.mxu1 }
  0xbd   : > { %v333_v31 = vadd.f32 %v332_v27, %v290_v24  ;;  %v352_v32 = vadd.f32 %v351_v28, %v290_v24 }
  0xbf   : > { %v360_v37 = vmax.f32 %v333_v31, 0.0  ;;  %v361_v38 = vmax.f32 %v352_v32, 0.0 }
  0xc1   : > { %v365_v41 = vpack.c.bf16 %v360_v37, %v358_v35  ;;  %v366_v42 = vpack.c.bf16 %v361_v38, %v359_v36 }
  0xc3   : > { %383 = vmatpush.bf16.msra.mxu2 %v365_v41  ;;  %396 = vmatpush.bf16.msra.mxu3 %v366_v42 }
  0xc7   : > { %384 = vmatpush.bf16.msra.mxu2 %v363_v45  ;;  %397 = vmatpush.bf16.msra.mxu3 %v364_v46 }
  0xca   : > { %525 = vmatmul.msk.bf16.vlgmr.msra.gmra.mxu2 %vm373_vm2, %v362_v47  ;;  %526 = vmatmul.msk.bf16.vlgmr.msra.gmra.mxu3 %vm373_vm2, %v362_v47 }
 0x14d   : > { %v386_v49 = vpop.f32.mrf.mxu2  ;;  %v399_v50 = vpop.f32.mrf.mxu3 }
 0x14e   : > { %v400_v51 = vadd.f32 %v399_v50, %v371_v48  ;;  %v387_v52 = vadd.f32 %v386_v49, %v371_v48 }
 0x150   : > { %v405_v53 = vrot.slane %v400_v51, 4 }
 0x152   : > { %v407_v54 = vsel %vm406_vm3, %v387_v52, %v405_v53 }
 0x153   : > { %409 = vst [vmem:[%s242_s25] sm:$0xff] %v407_v54 }
 0x154   : > { %622 = shalt.err (!%p619_p5)
}
 0x155   : > { %536 = dma.vmem_to_hbm [thread:$0]  (%p746_p4), %s427_s27, 128, %s429_s29, %s411_s21   ;;  %v388_v55 = vpop.f32.mrf.mxu2  ;;  %v401_v56 = vpop.f32.mrf.mxu3 }
 0x156 PF: > { %p542_p6 = scmp.ge.s32.totalorder %s673_s23, 2  ;;  %s440_s13 = sand.u32 1, %s653_s18  }
 0x157   : > { %s441_s15 = scalar_lea.sflag [#allocation3], %s440_s13 }
 0x158   : > { %p539_p7 = pnand %p542_p6, %p753_p8 }
 0x15a   : > { %p540_p9 = pneg %p539_p7 }
 0x15c   : > { %648 = dma.done.wait (%p540_p9), %s441_s15, 128  }
 0x15d   : > { %650 = vsyncadd (%p540_p9), %s441_s15, 4294967168  ;;  %s18_s23 = sadd.s32 1, %s673_s23   ;;  %s835_s18 = smov %s657_s19 }
 0x15e   : > { %p15_p10 = scmp.ge.s32.totalorder %s18_s23, 4   ;;  %s836_s19 = smov %s661_s20 }
 0x15f   : > { %s837_s20 = smov %s759_s6  ;;  %s838_s21 = smov %s669_s22 }
 0x160   : > { %s839_s22 = smov %s841_s26  ;;  %17 = sbr.rel (!%p15_p10) target bundleno = 4 (0x4), region = 75 }
 0x165   :  { %447 = vsyncpa [#allocation3], 1 }
 0x166   :  { %449 = vsyncpa [#allocation3 + $0x1], 1 }

</bundles_post_ra>
